<compile_context>
chip_gen: v5e
topology: v5e:2x2
jax: 0.10.0
libtpu: 0.0.40
codegen_flags: <defaults>
</compile_context>

<pallas_src>
import functools

import jax
import jax.numpy as jnp
from jax import lax
from jax.experimental import pallas as pl
from jax.experimental.pallas import tpu as pltpu


def _round_up(x, m):
    return (x + m - 1) // m * m


# dot_general dimension numbers
_NT = (((1,), (1,)), ((), ()))   # A(M,K) . B(N,K)^T -> (M,N)
_TN = (((0,), (0,)), ((), ()))   # A(K,M)^T . B(K,N) -> (M,N)

_BIG = (1 << 30)                 # index sentinel for argmin tie-breaking


def _vq_kernel(x_ref, e_ref, e2_ref, q_ref, idx_ref, sse_ref, *,
               n_valid, kc, mask_last, mac_dtype):
    """One tile of flattened rows against the full (padded) codebook."""
    i = pl.program_id(0)

    x = x_ref[...]                          # (TM, D) native dtype
    tm, d = x.shape
    kp = e_ref.shape[0]
    num_chunks = (kp + kc - 1) // kc        # static

    # Fold the -2 into the small (TM, D) operand once (exact: power-of-two scale).
    xs = (x * (-2.0)).astype(mac_dtype)

    # ---- pass 1: chunked squared distances + running per-lane argmin ---------
    # Transposed (kc, TM) orientation so the reduction result is lane-dense.
    # The per-row ||x||^2 term is dropped: constant along the codebook axis.
    min_val = None
    best = None
    for c in range(num_chunks):
        c0 = c * kc
        csz = min(kc, kp - c0)
        e_c = e_ref[pl.ds(c0, csz), :].astype(mac_dtype)      # (csz, D)
        e2_c = e2_ref[pl.ds(c0, csz), :]                      # (csz, 1) f32
        dist_t = e2_c + lax.dot_general(                      # (csz, TM) on MXU
            e_c, xs, _NT, preferred_element_type=jnp.float32)
        c_min = jnp.min(dist_t, axis=0, keepdims=True)        # (1, TM)
        iota_k = c0 + lax.broadcasted_iota(jnp.int32, dist_t.shape, 0)
        cand = jnp.where(dist_t <= c_min, iota_k, _BIG)
        c_idx = jnp.min(cand, axis=0, keepdims=True)          # (1, TM) lane-dense
        if c == 0:
            min_val, best = c_min, c_idx
        else:
            improve = c_min < min_val                         # strict: earlier chunk wins ties
            best = jnp.where(improve, c_idx, best)
            min_val = jnp.minimum(min_val, c_min)

    idx_ref[...] = best.reshape(1, 1, tm)

    # ---- pass 2: chunked one-hot gather on the MXU ---------------------------
    q = jnp.zeros((tm, d), jnp.float32)
    for c in range(num_chunks):
        c0 = c * kc
        csz = min(kc, kp - c0)
        e_c = e_ref[pl.ds(c0, csz), :]
        iota_k = c0 + lax.broadcasted_iota(jnp.int32, (csz, tm), 0)
        onehot_t = (iota_k == best).astype(e_c.dtype)         # (csz, TM)
        q = q + lax.dot_general(onehot_t, e_c, _TN,
                                preferred_element_type=jnp.float32)
    q_ref[...] = q.astype(q_ref.dtype)

    # ---- per-tile partial SSE (lane-dense (1, D)); final collapse in wrapper -
    diff = q - x.astype(jnp.float32)
    if mask_last:
        last = pl.num_programs(0) - 1

        @pl.when(i == last)
        def _():
            row_ids = i * tm + lax.broadcasted_iota(jnp.int32, diff.shape, 0)
            dm = jnp.where(row_ids < n_valid, diff, 0.0)
            sse_ref[...] = jnp.sum(dm * dm, axis=0, keepdims=True).reshape(1, 1, d)

        @pl.when(i != last)
        def _():
            sse_ref[...] = jnp.sum(diff * diff, axis=0, keepdims=True).reshape(1, 1, d)
    else:
        sse_ref[...] = jnp.sum(diff * diff, axis=0, keepdims=True).reshape(1, 1, d)


@functools.partial(
    jax.jit,
    static_argnames=("commitment_cost", "tm", "kc", "vmem_limit_bytes",
                     "n_split", "compute_dtype"))
def _vq_forward(inputs, embeddings, *, commitment_cost, tm, kc,
                vmem_limit_bytes, n_split, compute_dtype):
    K, D = embeddings.shape
    x_flat = inputs.reshape(-1, D)
    N = x_flat.shape[0]

    # Row tiling: aim for >= n_split tiles (v7x megacore) without over-tiling.
    tm_cap = max(128, _round_up(-(-N // n_split), 128))
    tm_eff = min(tm, tm_cap)
    n_pad = _round_up(N, tm_eff)
    num_tiles = n_pad // tm_eff
    if n_pad != N:
        x_flat = jnp.pad(x_flat, ((0, n_pad - N), (0, 0)))

    # Hoist grid-invariant codebook work out of the kernel.
    e = embeddings
    e2 = jnp.sum(e.astype(jnp.float32) ** 2, axis=1, keepdims=True)   # (K, 1)
    if compute_dtype is not None:
        # Optional lower-precision MXU path (bf16): halves x/e traffic & VMEM.
        e = e.astype(compute_dtype)
        x_flat = x_flat.astype(compute_dtype)
    kp = _round_up(K, 8)
    if kp != K:
        e = jnp.pad(e, ((0, kp - K), (0, 0)))
        # sentinel norm so padded codebook rows never win the argmin
        e2 = jnp.pad(e2, ((0, kp - K), (0, 0)), constant_values=1e30)

    kc_eff = min(kc, kp)
    mac_dtype = jnp.promote_types(x_flat.dtype, e.dtype)

    q_pad, idx_pad, sse_part = pl.pallas_call(
        functools.partial(_vq_kernel, n_valid=N, kc=kc_eff,
                          mask_last=(n_pad != N), mac_dtype=mac_dtype),
        out_shape=(
            jax.ShapeDtypeStruct((n_pad, D), inputs.dtype),            # quantized rows
            jax.ShapeDtypeStruct((num_tiles, 1, tm_eff), jnp.int32),   # lane-dense indices
            jax.ShapeDtypeStruct((num_tiles, 1, D), jnp.float32),      # per-tile SSE partials
        ),
        grid_spec=pltpu.PrefetchScalarGridSpec(
            num_scalar_prefetch=0,
            grid=(num_tiles,),
            in_specs=[
                pl.BlockSpec((tm_eff, D), lambda i: (i, 0)),   # input rows tile
                pl.BlockSpec((kp, D), lambda i: (0, 0)),       # full codebook (grid-invariant)
                pl.BlockSpec((kp, 1), lambda i: (0, 0)),       # precomputed ||e||^2
            ],
            out_specs=[
                pl.BlockSpec((tm_eff, D), lambda i: (i, 0)),
                pl.BlockSpec((1, 1, tm_eff), lambda i: (i, 0, 0)),
                pl.BlockSpec((1, 1, D), lambda i: (i, 0, 0)),
            ],
        ),
        compiler_params=pltpu.CompilerParams(
            dimension_semantics=("parallel",),   # no carried state -> shard across TCs
            vmem_limit_bytes=vmem_limit_bytes,
        ),
    )(x_flat, e, e2)

    sse = jnp.sum(sse_part)                       # collapse per-tile partials
    mse = sse / jnp.float32(N * D)
    # forward values: e_latent_loss == q_latent_loss == mse (detach only affects grads)
    loss = mse + jnp.float32(commitment_cost) * mse

    # straight-through estimator: forward value is just the quantized codes
    quantized = q_pad[:N].reshape(inputs.shape)
    encoding_indices = idx_pad.reshape(-1)[:N].reshape(N, 1)
    return quantized, loss, encoding_indices


def vector_quantizer(inputs, embeddings, commitment_cost=0.25, tm=None,
                     kc=1024, vmem_limit_bytes=None, compute_dtype=None):
    """Forward pass of VectorQuantizer.

    inputs:     (..., D) channels-last
    embeddings: (K, D) codebook
    returns (quantized, loss, encoding_indices):
      quantized:        same shape/dtype as inputs
      loss:             scalar f32
      encoding_indices: (N, 1) int32 with N = prod(inputs.shape) // D
    """
    # Generation-aware defaults (v7x: half the VMEM, two TensorCores).
    kind = jax.devices()[0].device_kind.lower()
    is_v7x = ("v7" in kind) or ("7x" in kind)
    if tm is None:
        tm = 512 if is_v7x else 1024
    if vmem_limit_bytes is None:
        vmem_limit_bytes = (48 if is_v7x else 64) * 1024 * 1024
    n_split = 2 if is_v7x else 1

    assert tm > 0 and tm % 128 == 0, "tm must be a positive multiple of 128"
    assert kc > 0 and kc % 8 == 0, "kc must be a positive multiple of 8"

    return _vq_forward(inputs, embeddings,
                       commitment_cost=float(commitment_cost),
                       tm=int(tm), kc=int(kc),
                       vmem_limit_bytes=int(vmem_limit_bytes),
                       n_split=int(n_split),
                       compute_dtype=compute_dtype)


if __name__ == "__main__":
    key = jax.random.PRNGKey(0)
    k_emb, k_x = jax.random.split(key)

    num_embeddings, embedding_dim = 64, 32
    B, H, W = 2, 8, 8

    # deterministic "nn.Embedding" init: uniform(-1/K, 1/K)
    embeddings = jax.random.uniform(
        k_emb, (num_embeddings, embedding_dim),
        minval=-1.0 / num_embeddings, maxval=1.0 / num_embeddings,
        dtype=jnp.float32)
    x = jax.random.normal(k_x, (B, H, W, embedding_dim), dtype=jnp.float32)

    quantized, loss, encoding_indices = vector_quantizer(x, embeddings)
    jax.block_until_ready((quantized, loss, encoding_indices))

    # ---- lightweight, tie-robust correctness checks vs. a plain-JAX reference
    x_flat = x.reshape(-1, embedding_dim)
    d2 = (jnp.sum(x_flat ** 2, axis=1, keepdims=True)
          - 2.0 * (x_flat @ embeddings.T)
          + jnp.sum(embeddings ** 2, axis=1)[None, :])
    idx_k = encoding_indices[:, 0]

    assert quantized.shape == x.shape
    assert encoding_indices.shape == (B * H * W, 1)
    # chosen codeword must attain the minimum distance (up to fp tolerance)
    chosen = jnp.take_along_axis(d2, idx_k[:, None], axis=1)[:, 0]
    assert bool(jnp.all(chosen <= jnp.min(d2, axis=1) + 1e-5))
    # quantized rows must be exactly the gathered codebook rows
    assert bool(jnp.allclose(quantized.reshape(-1, embedding_dim),
                             embeddings[idx_k], atol=1e-6))
    # loss must equal (1 + commitment_cost) * mse of the kernel's own quantization
    mse_k = jnp.mean((quantized - x) ** 2)
    assert bool(jnp.allclose(loss, 1.25 * mse_k, rtol=1e-5, atol=1e-7))

    print("KERNEL_OK")
</pallas_src>

<mosaic_0001>
module attributes {stable_mosaic.version = 11 : i64} {
  func.func @_vq_kernel(%arg0: i32, %arg1: memref<128x32xf32, #tpu.memory_space<vmem>>, %arg2: memref<64x32xf32, #tpu.memory_space<vmem>>, %arg3: memref<64x1xf32, #tpu.memory_space<vmem>>, %arg4: memref<128x32xf32, #tpu.memory_space<vmem>>, %arg5: memref<1x1x128xi32, #tpu.memory_space<vmem>>, %arg6: memref<1x1x32xf32, #tpu.memory_space<vmem>>) attributes {dimension_semantics = [#tpu.dimension_semantics<parallel>], iteration_bounds = array<i64: 1>, scalar_prefetch = 0 : i64, scratch_operands = 0 : i64, tpu.core_type = #tpu.core_type<tc>, window_params = [{transform_indices = @transform_0, window_bounds = array<i64: 128, 32>}, {pipeline_mode = #tpu.pipeline_mode<synchronous>, transform_indices = @transform_1, window_bounds = array<i64: 64, 32>}, {pipeline_mode = #tpu.pipeline_mode<synchronous>, transform_indices = @transform_2, window_bounds = array<i64: 64, 1>}, {transform_indices = @transform_3, window_bounds = array<i64: 128, 32>}, {transform_indices = @transform_4, window_bounds = array<i64: 1, 1, 128>}, {transform_indices = @transform_5, window_bounds = array<i64: 1, 1, 32>}]} {
    %c0 = arith.constant 0 : index
    %c0_0 = arith.constant 0 : index
    %0 = vector.load %arg1[%c0, %c0_0] : memref<128x32xf32, #tpu.memory_space<vmem>>, vector<128x32xf32>
    %cst = arith.constant -2.000000e+00 : f32
    %1 = vector.broadcast %cst : f32 to vector<128x32xf32>
    %2 = arith.mulf %0, %1 : vector<128x32xf32>
    %c0_1 = arith.constant 0 : index
    %c0_2 = arith.constant 0 : index
    %3 = vector.load %arg2[%c0_1, %c0_2] : memref<64x32xf32, #tpu.memory_space<vmem>>, vector<64x32xf32>
    %c0_3 = arith.constant 0 : index
    %c0_4 = arith.constant 0 : index
    %4 = vector.load %arg3[%c0_3, %c0_4] : memref<64x1xf32, #tpu.memory_space<vmem>>, vector<64x1xf32>
    %cst_5 = arith.constant dense<0.000000e+00> : vector<64x128xf32>
    %5 = tpu.matmul %3, %2, %cst_5 {dimension_numbers = #tpu.dot_dimension_numbers<[1], [1], [0], [0], [0, 0, 1, 0], [], []>} : vector<64x32xf32>, vector<128x32xf32>, vector<64x128xf32> -> vector<64x128xf32>
    %6 = vector.broadcast %4 : vector<64x1xf32> to vector<64x128xf32>
    %7 = arith.addf %6, %5 : vector<64x128xf32>
    %cst_6 = arith.constant dense<0x7F800000> : vector<128xf32>
    %8 = vector.multi_reduction <minimumf>, %7, %cst_6 [0] : vector<64x128xf32> to vector<128xf32>
    %9 = vector.shape_cast %8 : vector<128xf32> to vector<1x128xf32>
    %10 = tpu.iota {dimensions = array<i32: 0>} : vector<64x128xi32>
    %c0_i32 = arith.constant 0 : i32
    %11 = vector.broadcast %c0_i32 : i32 to vector<64x128xi32>
    %12 = arith.addi %11, %10 : vector<64x128xi32>
    %13 = vector.broadcast %9 : vector<1x128xf32> to vector<64x128xf32>
    %14 = arith.cmpf ole, %7, %13 : vector<64x128xf32>
    %c1073741824_i32 = arith.constant 1073741824 : i32
    %15 = vector.broadcast %c1073741824_i32 : i32 to vector<64x128xi32>
    %16 = arith.select %14, %12, %15 : vector<64x128xi1>, vector<64x128xi32>
    %cst_7 = arith.constant dense<2147483647> : vector<128xi32>
    %17 = vector.multi_reduction <minsi>, %16, %cst_7 [0] : vector<64x128xi32> to vector<128xi32>
    %18 = vector.shape_cast %17 : vector<128xi32> to vector<1x128xi32>
    %19 = vector.shape_cast %18 : vector<1x128xi32> to vector<1x1x128xi32>
    %c0_8 = arith.constant 0 : index
    %c0_9 = arith.constant 0 : index
    %c0_10 = arith.constant 0 : index
    %20 = vector.load %arg5[%c0_8, %c0_9, %c0_10] : memref<1x1x128xi32, #tpu.memory_space<vmem>>, vector<1x1x128xi32>
    tpu.vector_store %arg5[%c0_8, %c0_9, %c0_10], %19 {strides = array<i32>} : memref<1x1x128xi32, #tpu.memory_space<vmem>>, vector<1x1x128xi32>,
    %cst_11 = arith.constant 0.000000e+00 : f32
    %21 = vector.broadcast %cst_11 : f32 to vector<128x32xf32>
    %c0_12 = arith.constant 0 : index
    %c0_13 = arith.constant 0 : index
    %22 = vector.load %arg2[%c0_12, %c0_13] : memref<64x32xf32, #tpu.memory_space<vmem>>, vector<64x32xf32>
    %23 = tpu.iota {dimensions = array<i32: 0>} : vector<64x128xi32>
    %c0_i32_14 = arith.constant 0 : i32
    %24 = vector.broadcast %c0_i32_14 : i32 to vector<64x128xi32>
    %25 = arith.addi %24, %23 : vector<64x128xi32>
    %26 = vector.broadcast %18 : vector<1x128xi32> to vector<64x128xi32>
    %27 = arith.cmpi eq, %25, %26 : vector<64x128xi32>
    %28 = arith.extui %27 : vector<64x128xi1> to vector<64x128xi32>
    %29 = arith.sitofp %28 : vector<64x128xi32> to vector<64x128xf32>
    %cst_15 = arith.constant dense<0.000000e+00> : vector<128x32xf32>
    %30 = tpu.matmul %29, %22, %cst_15 {dimension_numbers = #tpu.dot_dimension_numbers<[0], [0], [1], [1], [0, 1, 1, 1], [], []>} : vector<64x128xf32>, vector<64x32xf32>, vector<128x32xf32> -> vector<128x32xf32>
    %31 = arith.addf %21, %30 : vector<128x32xf32>
    %c0_16 = arith.constant 0 : index
    %c0_17 = arith.constant 0 : index
    %32 = vector.load %arg4[%c0_16, %c0_17] : memref<128x32xf32, #tpu.memory_space<vmem>>, vector<128x32xf32>
    tpu.vector_store %arg4[%c0_16, %c0_17], %31 {strides = array<i32>} : memref<128x32xf32, #tpu.memory_space<vmem>>, vector<128x32xf32>,
    %33 = arith.subf %31, %0 : vector<128x32xf32>
    %34 = arith.mulf %33, %33 : vector<128x32xf32>
    %cst_18 = arith.constant dense<0.000000e+00> : vector<32xf32>
    %35 = vector.multi_reduction <add>, %34, %cst_18 [0] : vector<128x32xf32> to vector<32xf32>
    %36 = vector.shape_cast %35 : vector<32xf32> to vector<1x32xf32>
    %37 = vector.shape_cast %36 : vector<1x32xf32> to vector<1x1x32xf32>
    %c0_19 = arith.constant 0 : index
    %c0_20 = arith.constant 0 : index
    %c0_21 = arith.constant 0 : index
    %38 = vector.load %arg6[%c0_19, %c0_20, %c0_21] : memref<1x1x32xf32, #tpu.memory_space<vmem>>, vector<1x1x32xf32>
    tpu.vector_store %arg6[%c0_19, %c0_20, %c0_21], %37 {strides = array<i32>} : memref<1x1x32xf32, #tpu.memory_space<vmem>>, vector<1x1x32xf32>,
    return
  }
  func.func @transform_0(%arg0: i32) -> (i32, i32) {
    %c0_i32 = arith.constant 0 : i32
    %c0_i32_0 = arith.constant 0 : i32
    return %arg0, %c0_i32 : i32, i32
  }
  func.func @transform_1(%arg0: i32) -> (i32, i32) {
    %c0_i32 = arith.constant 0 : i32
    %c0_i32_0 = arith.constant 0 : i32
    %c0_i32_1 = arith.constant 0 : i32
    return %c0_i32, %c0_i32_0 : i32, i32
  }
  func.func @transform_2(%arg0: i32) -> (i32, i32) {
    %c0_i32 = arith.constant 0 : i32
    %c0_i32_0 = arith.constant 0 : i32
    %c0_i32_1 = arith.constant 0 : i32
    return %c0_i32, %c0_i32_0 : i32, i32
  }
  func.func @transform_3(%arg0: i32) -> (i32, i32) {
    %c0_i32 = arith.constant 0 : i32
    %c0_i32_0 = arith.constant 0 : i32
    return %arg0, %c0_i32 : i32, i32
  }
  func.func @transform_4(%arg0: i32) -> (i32, i32, i32) {
    %c0_i32 = arith.constant 0 : i32
    %c0_i32_0 = arith.constant 0 : i32
    %c0_i32_1 = arith.constant 0 : i32
    return %arg0, %c0_i32, %c0_i32_0 : i32, i32, i32
  }
  func.func @transform_5(%arg0: i32) -> (i32, i32, i32) {
    %c0_i32 = arith.constant 0 : i32
    %c0_i32_0 = arith.constant 0 : i32
    %c0_i32_1 = arith.constant 0 : i32
    return %arg0, %c0_i32, %c0_i32_0 : i32, i32, i32
  }
}

</mosaic_0001>

<bundles_post_ra>
// kernel: _vq_forward.1
= control target key start
LH: loop header
LB: loop body
LE: loop exit
PB: predicated region body
PF: predicated region fallthrough
CT: control target
= control target key end

     0   :  { %11 = vsyncpa [#allocation3], 0  ;;  %vm67_vm0 = vcmask 261120   ;;  %s1028_s0 = inlined_call_operand.vmem [shape: f32[128,32], index: 0, kind: input, shape index: {}]   ;;  %s1029_s1 = inlined_call_operand.vmem [shape: f32[64,32], index: 1, kind: input, shape index: {}]   ;;  %s1030_s2 = inlined_call_operand.vmem [shape: f32[64,1], index: 2, kind: input, shape index: {}]   ;;  %s1031_s3 = inlined_call_operand.hbm [shape: f32[128,32], index: 3, kind: output, shape index: {0}]   ;;  %s1032_s4 = inlined_call_operand.hbm [shape: s32[1,1,128], index: 4, kind: output, shape index: {1}]   ;;  %s1033_s5 = inlined_call_operand.vmem [shape: f32[1,1,32], index: 5, kind: output, shape index: {2}]  }
   0x1   :  { %v766_v0 = vld [vmem:[%s1028_s0 + $0x78] sm:$0xff]  ;;  %v771_v1 = vld [vmem:[%s1028_s0 + $0x70] sm:$0xff] }
   0x2   :  { %v50_v2 = vmul.f32 -2.0, %v766_v0  ;;  %v49_v3 = vmul.f32 -2.0, %v771_v1 }
   0x4   :  { %642 = vmatpush.xpose.msk.msra.mxu3 %vm67_vm0, %v50_v2  ;;  %594 = vmatpush.xpose.msk.msra.mxu0 %vm67_vm0, %v50_v2 }
   0x5   :  { %12 = vsyncpa [#allocation5], 0  ;;  %v780_v4 = vld [vmem:[%s1028_s0 + $0x68] sm:$0xff]  ;;  %v788_v6 = vld [vmem:[%s1028_s0 + $0x60] sm:$0xff]  ;;  %v727_v21 = vmov 0   ;;  %s576_s8 = sshll.u32 %s1032_s4, 4  ;;  %s577_s8 = int_to_ptr.hbm [resolvable:$true] %s576_s8 }
   0x6   :  { %v48_v5 = vmul.f32 -2.0, %v780_v4  ;;  %v47_v7 = vmul.f32 -2.0, %v788_v6  ;;  %v796_v8 = vld [vmem:[%s1028_s0 + $0x58] sm:$0xff]  ;;  %v804_v10 = vld [vmem:[%s1028_s0 + $0x50] sm:$0xff]  ;;  %v812_v12 = vld [vmem:[%s1028_s0 + $0x48] sm:$0xff]  ;;  %673 = vset.pattern.permute.xlu1 %v727_v21  ;;  %672 = vset.pattern.permute.xlu0 %v727_v21  ;;  %s730_s4 = smov [#allocation2]  }
   0x7   :  { %v46_v9 = vmul.f32 -2.0, %v796_v8  ;;  %v45_v11 = vmul.f32 -2.0, %v804_v10  ;;  %v44_v13 = vmul.f32 -2.0, %v812_v12  ;;  %v820_v14 = vld [vmem:[%s1028_s0 + $0x40] sm:$0xff]  ;;  %v828_v16 = vld [vmem:[%s1028_s0 + $0x38] sm:$0xff]  ;;  %v836_v18 = vld [vmem:[%s1028_s0 + $0x30] sm:$0xff]  ;;  %674 = vset.pattern.permute.xlu2 %v727_v21 }
   0x8   :  { %643 = vmatpush.xpose.msk.msra.mxu3 %vm67_vm0, %v49_v3  ;;  %595 = vmatpush.xpose.msk.msra.mxu0 %vm67_vm0, %v49_v3  ;;  %v43_v15 = vmul.f32 -2.0, %v820_v14  ;;  %v42_v17 = vmul.f32 -2.0, %v828_v16  ;;  %v41_v19 = vmul.f32 -2.0, %v836_v18  ;;  %v844_v20 = vld [vmem:[%s1028_s0 + $0x28] sm:$0xff]  ;;  %v852_v23 = vld [vmem:[%s1028_s0 + $0x20] sm:$0xff]  ;;  %v61_v24 = vld [vmem:[%s1030_s2 + $0x10] sm:$0xff] }
   0x9   :  { %v40_v22 = vmul.f32 -2.0, %v844_v20  ;;  %v39_v25 = vmul.f32 -2.0, %v852_v23  ;;  %v863_v26 = vld [vmem:[%s1028_s0 + $0x18] sm:$0xff]  ;;  %193 = vperm.xlu1 %673, %v61_v24   ;;  %v871_v28 = vld [vmem:[%s1028_s0 + $0x10] sm:$0xff]  ;;  %v59_v30 = vld [vmem:[%s1030_s2] sm:$0xff]  ;;  %s560_s9 = sshll.u32 %s730_s4, 4  ;;  %s561_s9 = int_to_ptr.vmem [resolvable:$true] %s560_s9 }
   0xa   :  { %v38_v27 = vmul.f32 -2.0, %v863_v26  ;;  %v62_v29 = vld [vmem:[%s1030_s2 + $0x18] sm:$0xff]  ;;  %v37_v31 = vmul.f32 -2.0, %v871_v28  ;;  %v885_v32 = vld [vmem:[%s1028_s0 + $0x8] sm:$0xff]  ;;  %183 = vperm.xlu0 %672, %v59_v30   ;;  %v893_v34 = vld [vmem:[%s1028_s0] sm:$0xff]  ;;  %s562_s0 = sshll.u32 %s1031_s3, 4  ;;  %s563_s0 = int_to_ptr.hbm [resolvable:$true] %s562_s0 }
   0xb   :  { %v36_v33 = vmul.f32 -2.0, %v885_v32  ;;  %v60_v35 = vld [vmem:[%s1030_s2 + $0x8] sm:$0xff]  ;;  %v35_v36 = vmul.f32 -2.0, %v893_v34  ;;  %v58_v37 = vld [vmem:[%s1029_s1 + $0x38] sm:$0xff]  ;;  %v57_v38 = vld [vmem:[%s1029_s1 + $0x30] sm:$0xff]  ;;  %s731_s12 = smov 128  }
   0xc   :  { %644 = vmatpush.xpose.msk.msra.mxu3 %vm67_vm0, %v48_v5  ;;  %596 = vmatpush.xpose.msk.msra.mxu0 %vm67_vm0, %v48_v5  ;;  %v54_v39 = vld [vmem:[%s1029_s1 + $0x18] sm:$0xff]  ;;  %v51_v40 = vld [vmem:[%s1029_s1] sm:$0xff]  ;;  %v56_v41 = vld [vmem:[%s1029_s1 + $0x28] sm:$0xff]  ;;  %s732_s3 = smov 8  }
   0xd   :  { %412 = vmatpush.msra.mxu1 %v58_v37  ;;  %658 = vmatpush.msra.mxu2 %v58_v37  ;;  %v66_v42 = vld [vmem:[%s1030_s2 + $0x38] sm:$0xff]  ;;  %v65_v43 = vld [vmem:[%s1030_s2 + $0x30] sm:$0xff]  ;;  %v63_v44 = vld [vmem:[%s1030_s2 + $0x20] sm:$0xff] }
   0xe   :  { %v55_v45 = vld [vmem:[%s1029_s1 + $0x20] sm:$0xff]  ;;  %203 = vperm.xlu2 %674, %v63_v44   ;;  %v52_v46 = vld [vmem:[%s1029_s1 + $0x8] sm:$0xff]  ;;  %v53_v47 = vld [vmem:[%s1029_s1 + $0x10] sm:$0xff]  ;;  %s729_s1 = smov [#allocation4]  }
   0xf   :  { %413 = vmatpush.msra.mxu1 %v57_v38  ;;  %659 = vmatpush.msra.mxu2 %v57_v38  ;;  %v64_v48 = vld [vmem:[%s1030_s2 + $0x28] sm:$0xff]  ;;  %s574_s2 = sshll.u32 %s729_s1, 4  ;;  %s575_s2 = int_to_ptr.vmem [resolvable:$true] %s574_s2 }
  0x10   :  { %645 = vmatpush.xpose.msk.msra.mxu3 %vm67_vm0, %v47_v7  ;;  %597 = vmatpush.xpose.msk.msra.mxu0 %vm67_vm0, %v47_v7 }
  0x11   :  { %198 = vperm.xlu1 %673, %v62_v29   ;;  %414 = vmatpush.msra.mxu1 %v56_v41 }
  0x12   :  { %188 = vperm.xlu0 %672, %v60_v35   ;;  %660 = vmatpush.msra.mxu2 %v56_v41 }
  0x13   :  { %415 = vmatpush.msra.mxu1 %v55_v45 }
  0x14   :  { %646 = vmatpush.xpose.msk.msra.mxu3 %vm67_vm0, %v46_v9  ;;  %598 = vmatpush.xpose.msk.msra.mxu0 %vm67_vm0, %v46_v9 }
  0x15   :  { %416 = vmatpush.msra.mxu1 %v54_v39  ;;  %661 = vmatpush.msra.mxu2 %v55_v45 }
  0x16   :  { %208 = vperm.xlu2 %674, %v64_v48  }
  0x17   :  { %417 = vmatpush.msra.mxu1 %v53_v47  ;;  %662 = vmatpush.msra.mxu2 %v54_v39 }
  0x18   :  { %647 = vmatpush.xpose.msk.msra.mxu3 %vm67_vm0, %v45_v11  ;;  %599 = vmatpush.xpose.msk.msra.mxu0 %vm67_vm0, %v45_v11 }
  0x19   :  { %218 = vperm.xlu1 %673, %v66_v42   ;;  %418 = vmatpush.msra.mxu1 %v52_v46 }
  0x1a   :  { %213 = vperm.xlu0 %672, %v65_v43   ;;  %663 = vmatpush.msra.mxu2 %v53_v47 }
  0x1b   :  { %419 = vmatpush.msra.mxu1 %v51_v40 }
  0x1c   :  { %648 = vmatpush.xpose.msk.msra.mxu3 %vm67_vm0, %v44_v13  ;;  %600 = vmatpush.xpose.msk.msra.mxu0 %vm67_vm0, %v44_v13 }
  0x1d   :  { %664 = vmatpush.msra.mxu2 %v52_v46 }
  0x1f   :  { %665 = vmatpush.msra.mxu2 %v51_v40 }
  0x20   :  { %649 = vmatpush.xpose.msk.msra.mxu3 %vm67_vm0, %v43_v15  ;;  %601 = vmatpush.xpose.msk.msra.mxu0 %vm67_vm0, %v43_v15 }
  0x24   :  { %650 = vmatpush.xpose.msk.msra.mxu3 %vm67_vm0, %v42_v17  ;;  %602 = vmatpush.xpose.msk.msra.mxu0 %vm67_vm0, %v42_v17 }
  0x28   :  { %651 = vmatpush.xpose.msk.msra.mxu3 %vm67_vm0, %v41_v19  ;;  %603 = vmatpush.xpose.msk.msra.mxu0 %vm67_vm0, %v41_v19 }
  0x2c   :  { %652 = vmatpush.xpose.msk.msra.mxu3 %vm67_vm0, %v40_v22  ;;  %604 = vmatpush.xpose.msk.msra.mxu0 %vm67_vm0, %v40_v22 }
  0x30   :  { %653 = vmatpush.xpose.msk.msra.mxu3 %vm67_vm0, %v39_v25  ;;  %605 = vmatpush.xpose.msk.msra.mxu0 %vm67_vm0, %v39_v25 }
  0x34   :  { %654 = vmatpush.xpose.msk.msra.mxu3 %vm67_vm0, %v38_v27  ;;  %606 = vmatpush.xpose.msk.msra.mxu0 %vm67_vm0, %v38_v27 }
  0x38   :  { %655 = vmatpush.xpose.msk.msra.mxu3 %vm67_vm0, %v37_v31  ;;  %607 = vmatpush.xpose.msk.msra.mxu0 %vm67_vm0, %v37_v31 }
  0x3c   :  { %656 = vmatpush.xpose.msk.msra.mxu3 %vm67_vm0, %v36_v33  ;;  %608 = vmatpush.xpose.msk.msra.mxu0 %vm67_vm0, %v36_v33  ;;  %v242_v33 = vlaneseq }
  0x40   :  { %657 = vmatpush.xpose.msk.msra.mxu3 %vm67_vm0, %v35_v36  ;;  %609 = vmatpush.xpose.msk.msra.mxu0 %vm67_vm0, %v35_v36 }
  0x43   :  { %613 = vmatmul.msk.f32.vlgmr.msra.gmra.mxu3 %vm67_vm0, %v54_v39  ;;  %610 = vmatmul.msk.f32.vlgmr.msra.gmra.mxu0 %vm67_vm0, %v51_v40 }
  0x4b   :  { %614 = vmatmul.msk.f32.gmra.mxu3 %vm67_vm0, %v55_v45  ;;  %611 = vmatmul.msk.f32.gmra.mxu0 %vm67_vm0, %v52_v46 }
  0x53   :  { %615 = vmatmul.msk.f32.gmra.mxu3 %vm67_vm0, %v56_v41  ;;  %612 = vmatmul.msk.f32.gmra.mxu0 %vm67_vm0, %v53_v47 }
  0x5b   :  { %616 = vmatmul.msk.f32.gmra.mxu3 %vm67_vm0, %v57_v38 }
  0x63   :  { %617 = vmatmul.msk.f32.gmra.mxu3 %vm67_vm0, %v58_v37  ;;  %v243_v37 = vshrl.u32 %v242_v33, 7 }
  0x65   :  { %v244_v40 = vadd.s32 8, %v243_v37  ;;  %v245_v41 = vadd.s32 16, %v243_v37  ;;  %v246_v42 = vadd.s32 24, %v243_v37  ;;  %v247_v43 = vadd.s32 32, %v243_v37 }
  0x66   :  { %v248_v44 = vadd.s32 40, %v243_v37  ;;  %v947_v45 = vadd.s32 48, %v243_v37  ;;  %v949_v46 = vadd.s32 56, %v243_v37 }
  0x68   :  { %v204_v54 = vpop.permute.xlu2 %203 }
  0x70   :  { %v209_v60 = vpop.permute.xlu2 %208 }
  0x7b   :  { %v194_v53 = vpop.permute.xlu1 %193 }
  0x7c   :  { %v184_v51 = vpop.permute.xlu0 %183 }
  0x83   :  { %v199_v58 = vpop.permute.xlu1 %198 }
  0x84   :  { %v189_v56 = vpop.permute.xlu0 %188 }
  0x8b   :  { %v219_v9 = vpop.permute.xlu1 %218 }
  0x8c   :  { %v214_v63 = vpop.permute.xlu0 %213 }
  0xc0   :  { %v157_v52 = vpop.f32.mrf.mxu0 }
  0xc1   :  { %v221_v3 = vadd.f32 %v184_v51, %v157_v52 }
  0xc6   :  { %v166_v49 = vpop.f32.mrf.mxu3 }
  0xc7   :  { %v224_v13 = vadd.f32 %v199_v58, %v166_v49 }
  0xc8   :  { %v160_v57 = vpop.f32.mrf.mxu0 }
  0xc9   :  { %v222_v61 = vadd.f32 %v189_v56, %v160_v57 }
  0xce   :  { %v169_v50 = vpop.f32.mrf.mxu3 }
  0xcf   :  { %v225_v5 = vadd.f32 %v204_v54, %v169_v50 }
  0xd0   :  { %v163_v2 = vpop.f32.mrf.mxu0 }
  0xd1   :  { %v223_v15 = vadd.f32 %v194_v53, %v163_v2  ;;  %v229_v21 = vmin.f32 %v221_v3, %v225_v5 }
  0xd6   :  { %v172_v55 = vpop.f32.mrf.mxu3 }
  0xd7   :  { %v226_v62 = vadd.f32 %v209_v60, %v172_v55 }
  0xd9   :  { %v230_v17 = vmin.f32 %v222_v61, %v226_v62 }
  0xdb   :  { %v233_v25 = vmin.f32 %v229_v21, %v230_v17 }
  0xde   :  { %v175_v59 = vpop.f32.mrf.mxu3 }
  0xdf   :  { %v227_v7 = vadd.f32 %v214_v63, %v175_v59 }
  0xe1   :  { %v231_v22 = vmin.f32 %v223_v15, %v227_v7 }
  0xe6   :  { %v178_v11 = vpop.f32.mrf.mxu3 }
  0xe7   :  { %v228_v19 = vadd.f32 %v219_v9, %v178_v11  ;;  %v728_v9 = vmov 0.0  }
  0xe9   :  { %v232_v24 = vmin.f32 %v224_v13, %v228_v19 }
  0xeb   :  { %v234_v27 = vmin.f32 %v231_v22, %v232_v24 }
  0xed   :  { %v235_v29 = vmin.f32 %v233_v25, %v234_v27 }
  0xef   :  { %v236_v30 = vrot.slane %v235_v29, 4 }
  0xf1   :  { %v237_v31 = vmin.f32 %v235_v29, %v236_v30 }
  0xf3   :  { %v238_v35 = vrot.slane %v237_v31, 2 }
  0xf5   :  { %v239_v36 = vmin.f32 %v237_v31, %v238_v35 }
  0xf7   :  { %v240_v38 = vrot.slane %v239_v36, 1 }
  0xf9   :  { %v241_v39 = vmin.f32 %v239_v36, %v240_v38 }
  0xfb   :  { %vm251_vm1 = vcmp.le.f32.partialorder %v221_v3, %v241_v39  ;;  %vm252_vm2 = vcmp.le.f32.partialorder %v222_v61, %v241_v39  ;;  %vm253_vm3 = vcmp.le.f32.partialorder %v223_v15, %v241_v39  ;;  %vm254_vm4 = vcmp.le.f32.partialorder %v224_v13, %v241_v39 }
  0xfc   :  { %vm255_vm5 = vcmp.le.f32.partialorder %v225_v5, %v241_v39  ;;  %vm256_vm6 = vcmp.le.f32.partialorder %v226_v62, %v241_v39  ;;  %vm257_vm7 = vcmp.le.f32.partialorder %v227_v7, %v241_v39  ;;  %vm258_vm8 = vcmp.le.f32.partialorder %v228_v19, %v241_v39 }
  0xfd   :  { %v259_v47 = vsel %vm251_vm1, %v243_v37, 1073741824  ;;  %v260_v48 = vsel %vm252_vm2, %v244_v40, 1073741824  ;;  %v261_v49 = vsel %vm253_vm3, %v245_v41, 1073741824  ;;  %v262_v50 = vsel %vm254_vm4, %v246_v42, 1073741824 }
  0xfe   :  { %v263_v51 = vsel %vm255_vm5, %v247_v43, 1073741824  ;;  %v264_v52 = vsel %vm256_vm6, %v248_v44, 1073741824  ;;  %v265_v53 = vsel %vm257_vm7, %v947_v45, 1073741824  ;;  %v266_v54 = vsel %vm258_vm8, %v949_v46, 1073741824 }
  0xff   :  { %vm267_vm9 = vcmp.lt.s32.totalorder %v259_v47, %v263_v51  ;;  %vm269_vm10 = vcmp.lt.s32.totalorder %v260_v48, %v264_v52  ;;  %vm271_vm11 = vcmp.lt.s32.totalorder %v261_v49, %v265_v53  ;;  %vm273_vm12 = vcmp.lt.s32.totalorder %v262_v50, %v266_v54 }
 0x100   :  { %v268_v55 = vsel %vm267_vm9, %v259_v47, %v263_v51  ;;  %v270_v56 = vsel %vm269_vm10, %v260_v48, %v264_v52  ;;  %v272_v57 = vsel %vm271_vm11, %v261_v49, %v265_v53  ;;  %v274_v58 = vsel %vm273_vm12, %v262_v50, %v266_v54 }
 0x101   :  { %vm275_vm13 = vcmp.lt.s32.totalorder %v268_v55, %v270_v56  ;;  %vm277_vm14 = vcmp.lt.s32.totalorder %v272_v57, %v274_v58  ;;  %vm355_vm12 = vcmask 523264  }
 0x102   :  { %v276_v59 = vsel %vm275_vm13, %v268_v55, %v270_v56  ;;  %v278_v60 = vsel %vm277_vm14, %v272_v57, %v274_v58  ;;  %vm554_vm13 = vcmask 253952  }
 0x103   :  { %vm279_vm15 = vcmp.lt.s32.totalorder %v276_v59, %v278_v60 }
 0x104   :  { %v280_v61 = vsel %vm279_vm15, %v276_v59, %v278_v60 }
 0x105   :  { %v281_v62 = vrot.slane %v280_v61, 4 }
 0x107   :  { %vm282_vm1 = vcmp.lt.s32.totalorder %v280_v61, %v281_v62 }
 0x108   :  { %v283_v63 = vsel %vm282_vm1, %v280_v61, %v281_v62 }
 0x109   :  { %v284_v2 = vrot.slane %v283_v63, 2 }
 0x10b   :  { %vm285_vm2 = vcmp.lt.s32.totalorder %v283_v63, %v284_v2 }
 0x10c   :  { %v286_v3 = vsel %vm285_vm2, %v283_v63, %v284_v2 }
 0x10d   :  { %v287_v5 = vrot.slane %v286_v3, 1 }
 0x10f   :  { %vm288_vm3 = vcmp.lt.s32.totalorder %v286_v3, %v287_v5 }
 0x110   :  { %v289_v7 = vsel %vm288_vm3, %v286_v3, %v287_v5 }
 0x111   :  { %290 = vst [vmem:[#allocation4] sm:$0x1] %v289_v7  ;;  %vm299_vm4 = vcmp.eq.s32.totalorder %v243_v37, %v289_v7  ;;  %vm300_vm5 = vcmp.eq.s32.totalorder %v244_v40, %v289_v7  ;;  %vm301_vm6 = vcmp.eq.s32.totalorder %v245_v41, %v289_v7  ;;  %vm302_vm7 = vcmp.eq.s32.totalorder %v246_v42, %v289_v7 }
 0x112   :  { %v618_v11 = vsel %vm299_vm4, 1.0, %v728_v9  ;;  %v619_v13 = vsel %vm300_vm5, 1.0, %v728_v9  ;;  %v620_v15 = vsel %vm301_vm6, 1.0, %v728_v9  ;;  %v621_v17 = vsel %vm302_vm7, 1.0, %v728_v9  ;;  %579 = dma.vmem_to_hbm [thread:$0]  %s575_s2, 16, %s577_s8, [#allocation5]  }
 0x113   :  { %323 = vxpose.xlu2.b32.start [1/8] (short) %v618_v11, 128  ;;  %vm303_vm8 = vcmp.eq.s32.totalorder %v247_v43, %v289_v7  ;;  %vm304_vm9 = vcmp.eq.s32.totalorder %v248_v44, %v289_v7  ;;  %vm305_vm10 = vcmp.eq.s32.totalorder %v947_v45, %v289_v7  ;;  %vm306_vm11 = vcmp.eq.s32.totalorder %v949_v46, %v289_v7 }
 0x114   :  { %v622_v19 = vsel %vm303_vm8, 1.0, %v728_v9  ;;  %v623_v21 = vsel %vm304_vm9, 1.0, %v728_v9  ;;  %v624_v22 = vsel %vm305_vm10, 1.0, %v728_v9  ;;  %v625_v24 = vsel %vm306_vm11, 1.0, %v728_v9 }
 0x11b   :  { %324 = vxpose.xlu2.b32.cont [2/8] (short) %v619_v13, 128 }
 0x123   :  { %325 = vxpose.xlu2.b32.cont [3/8] (short) %v620_v15, 128 }
 0x12b   :  { %326 = vxpose.xlu2.b32.cont [4/8] (short) %v621_v17, 128 }
 0x133   :  { %327 = vxpose.xlu2.b32.cont [5/8] (short) %v622_v19, 128 }
 0x13b   :  { %328 = vxpose.xlu2.b32.cont [6/8] (short) %v623_v21, 128 }
 0x143   :  { %329 = vxpose.xlu2.b32.cont [7/8] (short) %v624_v22, 128 }
 0x14b   :  { %330 = vxpose.xlu2.b32.end [8/8] (short) %v625_v24, 128 }
 0x1ac   :  { %v339_v25 = vpop.trf.xlu2 }
 0x1ad   :  { %626 = vmatmul.msk.f32.vlgmr.msra.gmra.mxu1 %vm355_vm12, %v339_v25 }
 0x1b4   :  { %v340_v27 = vpop.trf.xlu2 }
 0x1b5   :  { %627 = vmatmul.msk.f32.gmra.mxu1 %vm355_vm12, %v340_v27 }
 0x1bc   :  { %v341_v29 = vpop.trf.xlu2 }
 0x1bd   :  { %628 = vmatmul.msk.f32.gmra.mxu1 %vm355_vm12, %v341_v29 }
 0x1c4   :  { %v342_v30 = vpop.trf.xlu2 }
 0x1c5   :  { %629 = vmatmul.msk.f32.gmra.mxu1 %vm355_vm12, %v342_v30 }
 0x1cc   :  { %v343_v31 = vpop.trf.xlu2 }
 0x1cd   :  { %630 = vmatmul.msk.f32.gmra.mxu1 %vm355_vm12, %v343_v31 }
 0x1d4   :  { %v344_v33 = vpop.trf.xlu2 }
 0x1d5   :  { %631 = vmatmul.msk.f32.gmra.mxu1 %vm355_vm12, %v344_v33 }
 0x1dc   :  { %v345_v35 = vpop.trf.xlu2 }
 0x1dd   :  { %632 = vmatmul.msk.f32.gmra.mxu1 %vm355_vm12, %v345_v35 }
 0x1e4   :  { %v346_v36 = vpop.trf.xlu2 }
 0x1e5   :  { %633 = vmatmul.msk.f32.vlgmr.msra.gmra.mxu2 %vm355_vm12, %v346_v36 }
 0x1ec   :  { %v347_v37 = vpop.trf.xlu2 }
 0x1ed   :  { %634 = vmatmul.msk.f32.gmra.mxu2 %vm355_vm12, %v347_v37 }
 0x1f4   :  { %v348_v38 = vpop.trf.xlu2 }
 0x1f5   :  { %635 = vmatmul.msk.f32.gmra.mxu2 %vm355_vm12, %v348_v38 }
 0x1fc   :  { %v349_v39 = vpop.trf.xlu2 }
 0x1fd   :  { %636 = vmatmul.msk.f32.gmra.mxu2 %vm355_vm12, %v349_v39 }
 0x204   :  { %v350_v40 = vpop.trf.xlu2 }
 0x205   :  { %637 = vmatmul.msk.f32.gmra.mxu2 %vm355_vm12, %v350_v40 }
 0x20c   :  { %v351_v41 = vpop.trf.xlu2 }
 0x20d   :  { %638 = vmatmul.msk.f32.gmra.mxu2 %vm355_vm12, %v351_v41 }
 0x214   :  { %v352_v42 = vpop.trf.xlu2 }
 0x215   :  { %639 = vmatmul.msk.f32.gmra.mxu2 %vm355_vm12, %v352_v42 }
 0x21c   :  { %v353_v43 = vpop.trf.xlu2 }
 0x21d   :  { %640 = vmatmul.msk.f32.gmra.mxu2 %vm355_vm12, %v353_v43 }
 0x224   :  { %v354_v44 = vpop.trf.xlu2 }
 0x225   :  { %641 = vmatmul.msk.f32.gmra.mxu2 %vm355_vm12, %v354_v44 }
 0x22a   :  { %v421_v45 = vpop.f32.mrf.mxu1 }
 0x22b   :  { %469 = vst.msk [vmem:[#allocation2] sm:$0xff] %vm67_vm0, %v421_v45  ;;  %v485_v46 = vsub.f32 %v421_v45, %v893_v34 }
 0x22d   :  { %v501_v48 = vmul.f32 %v485_v46, %v485_v46 }
 0x22f   :  { %v517_v51 = vsel %vm67_vm0, %v501_v48, 0.0 }
 0x232   :  { %v424_v47 = vpop.f32.mrf.mxu1 }
 0x233   :  { %470 = vst.msk [vmem:[#allocation2 + $0x8] sm:$0xff] %vm67_vm0, %v424_v47  ;;  %v486_v49 = vsub.f32 %v424_v47, %v885_v32 }
 0x235   :  { %v502_v50 = vmul.f32 %v486_v49, %v486_v49 }
 0x237   :  { %v518_v52 = vsel %vm67_vm0, %v502_v50, 0.0 }
 0x238   :  { %v519_v53 = vadd.f32 %v518_v52, %v517_v51 }
 0x23a   :  { %v427_v54 = vpop.f32.mrf.mxu1 }
 0x23b   :  { %471 = vst.msk [vmem:[#allocation2 + $0x10] sm:$0xff] %vm67_vm0, %v427_v54  ;;  %v487_v55 = vsub.f32 %v427_v54, %v871_v28 }
 0x23d   :  { %v503_v56 = vmul.f32 %v487_v55, %v487_v55 }
 0x23f   :  { %v520_v34 = vsel %vm67_vm0, %v503_v56, 0.0 }
 0x240   :  { %v521_v32 = vadd.f32 %v520_v34, %v519_v53 }
 0x242   :  { %v430_v57 = vpop.f32.mrf.mxu1 }
 0x243   :  { %472 = vst.msk [vmem:[#allocation2 + $0x18] sm:$0xff] %vm67_vm0, %v430_v57  ;;  %v488_v58 = vsub.f32 %v430_v57, %v863_v26 }
 0x245   :  { %v504_v59 = vmul.f32 %v488_v58, %v488_v58 }
 0x247   :  { %v522_v28 = vsel %vm67_vm0, %v504_v59, 0.0 }
 0x248   :  { %v523_v60 = vadd.f32 %v522_v28, %v521_v32 }
 0x24a   :  { %v433_v61 = vpop.f32.mrf.mxu1 }
 0x24b   :  { %473 = vst.msk [vmem:[#allocation2 + $0x20] sm:$0xff] %vm67_vm0, %v433_v61  ;;  %v489_v62 = vsub.f32 %v433_v61, %v852_v23 }
 0x24d   :  { %v505_v63 = vmul.f32 %v489_v62, %v489_v62 }
 0x24f   :  { %v524_v2 = vsel %vm67_vm0, %v505_v63, 0.0 }
 0x250   :  { %v525_v3 = vadd.f32 %v524_v2, %v523_v60 }
 0x252   :  { %v436_v5 = vpop.f32.mrf.mxu1 }
 0x253   :  { %474 = vst.msk [vmem:[#allocation2 + $0x28] sm:$0xff] %vm67_vm0, %v436_v5  ;;  %v490_v7 = vsub.f32 %v436_v5, %v844_v20 }
 0x255   :  { %v506_v9 = vmul.f32 %v490_v7, %v490_v7 }
 0x257   :  { %v526_v26 = vsel %vm67_vm0, %v506_v9, 0.0 }
 0x258   :  { %v527_v11 = vadd.f32 %v526_v26, %v525_v3 }
 0x25a   :  { %v439_v13 = vpop.f32.mrf.mxu1 }
 0x25b   :  { %475 = vst.msk [vmem:[#allocation2 + $0x30] sm:$0xff] %vm67_vm0, %v439_v13  ;;  %v491_v22 = vsub.f32 %v439_v13, %v836_v18 }
 0x25d   :  { %v507_v25 = vmul.f32 %v491_v22, %v491_v22 }
 0x25f   :  { %v528_v33 = vsel %vm67_vm0, %v507_v25, 0.0 }
 0x268   :  { %v442_v15 = vpop.f32.mrf.mxu2 }
 0x269   :  { %476 = vst.msk [vmem:[#allocation2 + $0x38] sm:$0xff] %vm67_vm0, %v442_v15  ;;  %v492_v24 = vsub.f32 %v442_v15, %v828_v16  ;;  %v529_v16 = vadd.f32 %v528_v33, %v527_v11 }
 0x26b   :  { %v508_v29 = vmul.f32 %v492_v24, %v492_v24 }
 0x26d   :  { %v530_v18 = vsel %vm67_vm0, %v508_v29, 0.0 }
 0x270   :  { %v445_v23 = vpop.f32.mrf.mxu2 }
 0x271   :  { %477 = vst.msk [vmem:[#allocation2 + $0x40] sm:$0xff] %vm67_vm0, %v445_v23  ;;  %v493_v27 = vsub.f32 %v445_v23, %v820_v14 }
 0x273   :  { %v509_v35 = vmul.f32 %v493_v27, %v493_v27 }
 0x275   :  { %v532_v39 = vsel %vm67_vm0, %v509_v35, 0.0 }
 0x278   :  { %v448_v17 = vpop.f32.mrf.mxu2 }
 0x279   :  { %478 = vst.msk [vmem:[#allocation2 + $0x48] sm:$0xff] %vm67_vm0, %v448_v17  ;;  %v494_v30 = vsub.f32 %v448_v17, %v812_v12  ;;  %v531_v12 = vadd.f32 %v530_v18, %v529_v16 }
 0x27b   :  { %v510_v37 = vmul.f32 %v494_v30, %v494_v30 }
 0x27d   :  { %v534_v41 = vsel %vm67_vm0, %v510_v37, 0.0 }
 0x280   :  { %v451_v19 = vpop.f32.mrf.mxu2 }
 0x281   :  { %479 = vst.msk [vmem:[#allocation2 + $0x50] sm:$0xff] %vm67_vm0, %v451_v19  ;;  %v495_v36 = vsub.f32 %v451_v19, %v804_v10  ;;  %v533_v10 = vadd.f32 %v532_v39, %v531_v12 }
 0x283   :  { %v511_v14 = vmul.f32 %v495_v36, %v495_v36  ;;  %v535_v47 = vadd.f32 %v534_v41, %v533_v10 }
 0x285   :  { %v536_v45 = vsel %vm67_vm0, %v511_v14, 0.0 }
 0x288   :  { %v454_v20 = vpop.f32.mrf.mxu2 }
 0x289   :  { %480 = vst.msk [vmem:[#allocation2 + $0x58] sm:$0xff] %vm67_vm0, %v454_v20  ;;  %v496_v38 = vsub.f32 %v454_v20, %v796_v8 }
 0x28b   :  { %v512_v42 = vmul.f32 %v496_v38, %v496_v38 }
 0x28d   :  { %v538_v48 = vsel %vm67_vm0, %v512_v42, 0.0 }
 0x290   :  { %v457_v21 = vpop.f32.mrf.mxu2 }
 0x291   :  { %481 = vst.msk [vmem:[#allocation2 + $0x60] sm:$0xff] %vm67_vm0, %v457_v21  ;;  %v497_v40 = vsub.f32 %v457_v21, %v788_v6 }
 0x293   :  { %v513_v46 = vmul.f32 %v497_v40, %v497_v40 }
 0x295   :  { %v540_v6 = vsel %vm67_vm0, %v513_v46, 0.0 }
 0x298   :  { %v460_v31 = vpop.f32.mrf.mxu2 }
 0x299   :  { %482 = vst.msk [vmem:[#allocation2 + $0x68] sm:$0xff] %vm67_vm0, %v460_v31  ;;  %v498_v43 = vsub.f32 %v460_v31, %v780_v4  ;;  %v537_v4 = vadd.f32 %v536_v45, %v535_v47 }
 0x29b   :  { %v514_v49 = vmul.f32 %v498_v43, %v498_v43  ;;  %v539_v51 = vadd.f32 %v538_v48, %v537_v4 }
 0x29d   :  { %v542_v52 = vsel %vm67_vm0, %v514_v49, 0.0 }
 0x2a0   :  { %v463_v44 = vpop.f32.mrf.mxu2 }
 0x2a1   :  { %483 = vst.msk [vmem:[#allocation2 + $0x70] sm:$0xff] %vm67_vm0, %v463_v44  ;;  %v499_v8 = vsub.f32 %v463_v44, %v771_v1  ;;  %v541_v1 = vadd.f32 %v540_v6, %v539_v51 }
 0x2a3   :  { %v515_v50 = vmul.f32 %v499_v8, %v499_v8  ;;  %v543_v56 = vadd.f32 %v542_v52, %v541_v1 }
 0x2a5   :  { %v544_v54 = vsel %vm67_vm0, %v515_v50, 0.0 }
 0x2a6   :  { %v545_v32 = vadd.f32 %v544_v54, %v543_v56 }
 0x2a8   :  { %v466_v53 = vpop.f32.mrf.mxu2 }
 0x2a9   :  { %484 = vst.msk [vmem:[#allocation2 + $0x78] sm:$0xff] %vm67_vm0, %v466_v53  ;;  %v500_v55 = vsub.f32 %v466_v53, %v766_v0 }
 0x2aa   :  { %568 = dma.vmem_to_hbm [thread:$0]  %s561_s9, 2048, %s563_s0, [#allocation3], %s731_s12, %s731_s12, %s732_s3  }
 0x2ab   :  { %v516_v34 = vmul.f32 %v500_v55, %v500_v55 }
 0x2ad   :  { %v546_v57 = vsel %vm67_vm0, %v516_v34, 0.0 }
 0x2ae   :  { %v547_v58 = vadd.f32 %v546_v57, %v545_v32 }
 0x2b0   :  { %v548_v59 = vrot.slane %v547_v58, 4 }
 0x2b2   :  { %v549_v28 = vadd.f32 %v548_v59, %v547_v58 }
 0x2b4   :  { %v550_v60 = vrot.slane %v549_v28, 2 }
 0x2b6   :  { %v551_v61 = vadd.f32 %v550_v60, %v549_v28 }
 0x2b8   :  { %v552_v62 = vrot.slane %v551_v61, 1 }
 0x2ba   :  { %v553_v63 = vadd.f32 %v552_v62, %v551_v61 }
 0x2bc   :  { %555 = vst.msk [vmem:[%s1033_s5] sm:$0x1] %vm554_vm13, %v553_v63 }
 0x2bd   :  { %723 = dma.done.wait [#allocation3], 2048  }
 0x2be   :  { %724 = vsyncadd [#allocation3], 4294965248 }
 0x2bf   :  { %725 = dma.done.wait [#allocation5], 16  }
 0x2c0   :  { %726 = vsyncadd [#allocation5], 4294967280 }
 0x2c1   :  { %592 = vsyncpa [#allocation3], 1 }
 0x2c2   :  { %593 = vsyncpa [#allocation5], 1 }

</bundles_post_ra>
